<compile_context>
chip_gen: v7x
topology: tpu7x:2x2x1
jax: 0.10.0
libtpu: 0.0.40
codegen_flags: <defaults>
</compile_context>

<pallas_src>
import jax
import jax.numpy as jnp
from jax.experimental import pallas as pl
from jax.experimental.pallas import tpu as pltpu

# Split very large copies into a few concurrent DMAs (one semaphore each);
# small arrays go out as a single DMA.
_MAX_CHUNKS = 4
_MIN_CHUNK_BYTES = 2 * 1024 * 1024


def _make_dma_copy_kernel(chunks):
    """Builds a kernel that copies `x` to `o` via HBM->HBM DMAs.

    `chunks` is a static tuple of (start, size) slices along axis 0.
    """

    def kernel(x_hbm, o_hbm, sems):
        copies = []
        for idx, (start, size) in enumerate(chunks):
            cp = pltpu.make_async_copy(
                x_hbm.at[pl.ds(start, size)],
                o_hbm.at[pl.ds(start, size)],
                sems.at[idx],
            )
            cp.start()
            copies.append(cp)
        # All DMAs are in flight; now wait for completion.
        for cp in copies:
            cp.wait()

    return kernel


def _chunk_plan(dim0: int, nbytes: int):
    """Static (start, size) chunks along axis 0 for concurrent DMAs."""
    n_chunks = max(1, min(_MAX_CHUNKS, dim0, nbytes // _MIN_CHUNK_BYTES))
    base, rem = divmod(dim0, n_chunks)
    chunks = []
    start = 0
    for c in range(n_chunks):
        size = base + (1 if c < rem else 0)
        chunks.append((start, size))
        start += size
    return tuple(chunks)


def forward_module(fwd_input: jax.Array, *, donated: bool = False) -> jax.Array:
    """Identity forward pass of ForwardModule.

    If the caller donates the input buffer (`donated=True`), the identity is
    metadata-only and no kernel runs.  Otherwise a single Pallas call performs
    the copy with a few large HBM->HBM DMAs (no VMEM round trip, no aliasing).
    """
    if donated or fwd_input.size == 0:
        return fwd_input

    x = fwd_input
    squeeze_back = False
    if x.ndim == 0:
        x = x.reshape(1)
        squeeze_back = True

    nbytes = int(x.size) * jnp.dtype(x.dtype).itemsize
    chunks = _chunk_plan(int(x.shape[0]), nbytes)

    out = pl.pallas_call(
        _make_dma_copy_kernel(chunks),
        out_shape=jax.ShapeDtypeStruct(x.shape, x.dtype),
        in_specs=[pl.BlockSpec(memory_space=pl.ANY)],
        out_specs=pl.BlockSpec(memory_space=pl.ANY),
        scratch_shapes=[pltpu.SemaphoreType.DMA((len(chunks),))],
        cost_estimate=pl.CostEstimate(
            flops=0, transcendentals=0, bytes_accessed=2 * nbytes
        ),
    )(x)

    if squeeze_back:
        out = out.reshape(())
    return out


if __name__ == "__main__":
    key = jax.random.PRNGKey(0)

    # Small NCHW-like input (the module is shape-agnostic).
    x = jax.random.normal(key, (2, 4, 16, 16), dtype=jnp.float32)
    y = forward_module(x)
    jax.block_until_ready(y)
    assert y.shape == x.shape and y.dtype == x.dtype
    assert bool(jnp.array_equal(y, x))

    # Larger input: exercises the multi-DMA (4-chunk) path (8 MiB, f32).
    x_big = jax.random.normal(key, (8, 256, 1024), dtype=jnp.float32)
    y_big = forward_module(x_big)
    jax.block_until_ready(y_big)
    assert y_big.shape == x_big.shape and y_big.dtype == x_big.dtype
    assert bool(jnp.array_equal(y_big, x_big))

    # Donated path: metadata-only identity (no kernel launch, zero HBM traffic).
    y_donated = forward_module(x, donated=True)
    assert y_donated is x

    print("KERNEL_OK")
</pallas_src>

<mosaic_0001>
module attributes {stable_mosaic.version = 11 : i64} {
  func.func @kernel(%arg0: memref<2x4x16x16xf32, #tpu.memory_space<any>>, %arg1: memref<2x4x16x16xf32, #tpu.memory_space<any>>, %arg2: memref<1x!tpu.dma_semaphore, #tpu.memory_space<semaphore_mem>>) attributes {dimension_semantics = [], scalar_prefetch = 0 : i64, scratch_operands = 1 : i64, tpu.core_type = #tpu.core_type<tc>} {
    %c0_i32 = arith.constant 0 : i32
    %c0_i32_0 = arith.constant 0 : i32
    %c0_i32_1 = arith.constant 0 : i32
    %c0_i32_2 = arith.constant 0 : i32
    %c0_i32_3 = arith.constant 0 : i32
    %0 = tpu.memref_slice %arg0[%c0_i32_0, %c0_i32_1, %c0_i32_2, %c0_i32_3] : memref<2x4x16x16xf32, #tpu.memory_space<any>> -> memref<2x4x16x16xf32, #tpu.memory_space<any>>
    %c0_i32_4 = arith.constant 0 : i32
    %c0_i32_5 = arith.constant 0 : i32
    %c0_i32_6 = arith.constant 0 : i32
    %c0_i32_7 = arith.constant 0 : i32
    %1 = tpu.memref_slice %arg1[%c0_i32_4, %c0_i32_5, %c0_i32_6, %c0_i32_7] : memref<2x4x16x16xf32, #tpu.memory_space<any>> -> memref<2x4x16x16xf32, #tpu.memory_space<any>>
    %2 = tpu.memref_slice %arg2[%c0_i32] : memref<1x!tpu.dma_semaphore, #tpu.memory_space<semaphore_mem>> -> memref<1x!tpu.dma_semaphore, #tpu.memory_space<semaphore_mem>>
    %3 = tpu.memref_squeeze %2 : memref<1x!tpu.dma_semaphore, #tpu.memory_space<semaphore_mem>> -> memref<!tpu.dma_semaphore, #tpu.memory_space<semaphore_mem>>
    tpu.enqueue_dma source(%0 : memref<2x4x16x16xf32, #tpu.memory_space<any>>) target(%1 : memref<2x4x16x16xf32, #tpu.memory_space<any>>) target_semaphore(%3 : memref<!tpu.dma_semaphore, #tpu.memory_space<semaphore_mem>>)
    %c0_i32_8 = arith.constant 0 : i32
    %c0_i32_9 = arith.constant 0 : i32
    %c0_i32_10 = arith.constant 0 : i32
    %c0_i32_11 = arith.constant 0 : i32
    %c0_i32_12 = arith.constant 0 : i32
    %4 = tpu.memref_slice %arg0[%c0_i32_9, %c0_i32_10, %c0_i32_11, %c0_i32_12] : memref<2x4x16x16xf32, #tpu.memory_space<any>> -> memref<2x4x16x16xf32, #tpu.memory_space<any>>
    %c0_i32_13 = arith.constant 0 : i32
    %c0_i32_14 = arith.constant 0 : i32
    %c0_i32_15 = arith.constant 0 : i32
    %c0_i32_16 = arith.constant 0 : i32
    %5 = tpu.memref_slice %arg1[%c0_i32_13, %c0_i32_14, %c0_i32_15, %c0_i32_16] : memref<2x4x16x16xf32, #tpu.memory_space<any>> -> memref<2x4x16x16xf32, #tpu.memory_space<any>>
    %6 = tpu.memref_slice %arg2[%c0_i32_8] : memref<1x!tpu.dma_semaphore, #tpu.memory_space<semaphore_mem>> -> memref<1x!tpu.dma_semaphore, #tpu.memory_space<semaphore_mem>>
    %7 = tpu.memref_squeeze %6 : memref<1x!tpu.dma_semaphore, #tpu.memory_space<semaphore_mem>> -> memref<!tpu.dma_semaphore, #tpu.memory_space<semaphore_mem>>
    tpu.wait_dma2 semaphore(%7 : memref<!tpu.dma_semaphore, #tpu.memory_space<semaphore_mem>>) src(%4 : memref<2x4x16x16xf32, #tpu.memory_space<any>>) dst(%5 : memref<2x4x16x16xf32, #tpu.memory_space<any>>)
    return
  }
}

</mosaic_0001>

<bundles_post_ra>
// kernel: tpu_custom_call.1
= control target key start
LH: loop header
LB: loop body
LE: loop exit
PB: predicated region body
PF: predicated region fallthrough
CT: control target
= control target key end

     0   :  { %s36_s6 = smov [#allocation2]   ;;  %s37_s7 = smov [#allocation3]   ;;  %s55_s0 = inlined_call_operand.hbm [shape: f32[2,4,16,16], index: 0, kind: input, shape index: {}]   ;;  %s56_s1 = inlined_call_operand.hbm [shape: f32[2,4,16,16], index: 1, kind: output, shape index: {}]  }
   0x1   :  { %s38_s8 = smov 0  }
   0x2   :  { %18 = dma.general %s55_s0, 2048, %s56_s1, %s36_s6, %s37_s7, [#allocation4], %s38_s8, 0  }
   0x3   :  { %34 = dma.done.wait [#allocation2], 2048 }
   0x4   :  { %35 = vsyncadd [#allocation2], 4294965248 }
   0x5   :  { %24 = vsyncmov [#allocation2] }
   0x8   :  { %s25_s13 = vpop.sfrf %24 }
   0x9   :  { %p30_p0 = scmp.ne.s32.totalorder %s25_s13, 0 }
   0xb   :  { %29 = shalt.err (%p30_p0)  }

</bundles_post_ra>
